<compile_context>
chip_gen: v7x
topology: tpu7x:2x2x1
jax: 0.10.0
libtpu: 0.0.40
codegen_flags: <defaults>
</compile_context>

<pallas_src>
import functools

import jax
import jax.numpy as jnp
from jax.experimental import pallas as pl
from jax.experimental.pallas import tpu as pltpu


def _round_up(n, m):
    return ((n + m - 1) // m) * m


def mlp_kernel(x_ref,
               w1_ref, b1_ref,
               w2_ref, b2_ref,
               w3_ref, b3_ref,
               w4_ref, b4_ref,
               o_ref):
    """One batch tile. Layout: (features, batch_tile); batch on lanes.

    Weights are (out, in) in the compute dtype; biases are (out, 1) f32.
    Matmuls accumulate in f32; elementwise math stays f32 (v5e-friendly).
    """
    cdt = w1_ref.dtype
    x = x_ref[...]                                            # (12, TB)

    h = jnp.dot(w1_ref[...], x,
                preferred_element_type=jnp.float32) + b1_ref[...]     # (32, TB)
    h = jnp.maximum(h, 0.0)

    h = jnp.dot(w2_ref[...], h.astype(cdt),
                preferred_element_type=jnp.float32) + b2_ref[...]     # (32, TB)
    h = jnp.maximum(h, 0.0)

    h = jnp.dot(w3_ref[...], h.astype(cdt),
                preferred_element_type=jnp.float32) + b3_ref[...]     # (32, TB)
    h = jnp.maximum(h, 0.0)

    h = jnp.dot(w4_ref[...], h.astype(cdt),
                preferred_element_type=jnp.float32) + b4_ref[...]     # (7, TB)

    o_ref[...] = h.astype(o_ref.dtype)


@functools.partial(jax.jit, static_argnames=("tb",))
def net_forward(x, params, *, tb=512):
    """x: (B, 12) float32; params: dict of (out,in) weights + (out,1) biases."""
    B, F = x.shape
    assert F == 12

    w1, b1 = params["w1"], params["b1"]
    w2, b2 = params["w2"], params["b2"]
    w3, b3 = params["w3"], params["b3"]
    w4, b4 = params["w4"], params["b4"]
    cdt = w1.dtype

    # Batch is on the lane axis -> tile must be a multiple of 128.
    TB = min(_round_up(tb, 128), _round_up(B, 128))
    Bp = _round_up(B, TB)

    # Pad ragged batch, transpose to (features, batch), cast once.
    xp = jnp.pad(x, ((0, Bp - B), (0, 0)))
    x_t = xp.T.astype(cdt)                                    # (12, Bp)

    const_spec = lambda a: pl.BlockSpec(a.shape, lambda i: (0, 0))

    itemsize = jnp.dtype(cdt).itemsize
    weight_bytes = sum(int(a.size) * a.dtype.itemsize
                       for a in (w1, b1, w2, b2, w3, b3, w4, b4))
    cost = pl.CostEstimate(
        flops=2 * Bp * (12 * 32 + 32 * 32 + 32 * 32 + 32 * 7),
        transcendentals=0,
        bytes_accessed=Bp * 12 * itemsize + Bp * 7 * 4 + weight_bytes,
    )

    out_t = pl.pallas_call(
        mlp_kernel,
        out_shape=jax.ShapeDtypeStruct((7, Bp), jnp.float32),
        grid=(Bp // TB,),
        in_specs=[
            pl.BlockSpec((12, TB), lambda i: (0, i)),   # x tile (batch on lanes)
            const_spec(w1), const_spec(b1),
            const_spec(w2), const_spec(b2),
            const_spec(w3), const_spec(b3),
            const_spec(w4), const_spec(b4),
        ],
        out_specs=pl.BlockSpec((7, TB), lambda i: (0, i)),
        compiler_params=pltpu.CompilerParams(
            dimension_semantics=("parallel",)),
        cost_estimate=cost,
    )(x_t, w1, b1, w2, b2, w3, b3, w4, b4)

    return out_t.T[:B]                                        # (B, 7) f32


def init_params(key, compute_dtype=jnp.float32):
    """PyTorch-style uniform(+/- 1/sqrt(fan_in)) init.

    Weights stored (out_features, in_features) in compute_dtype,
    biases stored (out_features, 1) in float32.
    """
    dims = [(12, 32), (32, 32), (32, 32), (32, 7)]
    params = {}
    for idx, (fan_in, fan_out) in enumerate(dims, start=1):
        key, kw, kb = jax.random.split(key, 3)
        bound = 1.0 / jnp.sqrt(float(fan_in))
        w = jax.random.uniform(kw, (fan_out, fan_in), jnp.float32,
                               minval=-bound, maxval=bound)
        b = jax.random.uniform(kb, (fan_out, 1), jnp.float32,
                               minval=-bound, maxval=bound)
        params[f"w{idx}"] = w.astype(compute_dtype)
        params[f"b{idx}"] = b
    return params


def reference_forward(x, params):
    """Plain-JAX reference (f32 math on the same stored parameters)."""
    w1 = params["w1"].astype(jnp.float32)
    w2 = params["w2"].astype(jnp.float32)
    w3 = params["w3"].astype(jnp.float32)
    w4 = params["w4"].astype(jnp.float32)
    b1, b2, b3, b4 = (params[f"b{i}"].reshape(1, -1) for i in (1, 2, 3, 4))
    h = jnp.maximum(x @ w1.T + b1, 0.0)
    h = jnp.maximum(h @ w2.T + b2, 0.0)
    h = jnp.maximum(h @ w3.T + b3, 0.0)
    return h @ w4.T + b4


if __name__ == "__main__":
    key = jax.random.PRNGKey(0)
    k_params, k_x = jax.random.split(key)
    x = jax.random.normal(k_x, (8, 12), jnp.float32)  # batch=8, features=12

    # f32 path: exact semantics of the PyTorch module.
    params_f32 = init_params(k_params, compute_dtype=jnp.float32)
    out = jax.block_until_ready(net_forward(x, params_f32))
    ref = reference_forward(x, params_f32)
    assert out.shape == (8, 7)
    assert jnp.allclose(out, ref, atol=1e-5, rtol=1e-5)

    # bf16 weights/inputs path (HBM-traffic win on v6e/v7x; f32 accumulation).
    params_bf16 = init_params(k_params, compute_dtype=jnp.bfloat16)
    out_bf16 = jax.block_until_ready(net_forward(x, params_bf16))
    ref_bf16 = reference_forward(x, params_bf16)
    assert out_bf16.shape == (8, 7)
    assert jnp.allclose(out_bf16, ref_bf16, atol=2e-2, rtol=2e-2)

    print("KERNEL_OK")
</pallas_src>

<mosaic_0001>
module attributes {stable_mosaic.version = 11 : i64} {
  func.func @mlp_kernel(%arg0: i32, %arg1: memref<12x128xf32, #tpu.memory_space<vmem>>, %arg2: memref<32x12xf32, #tpu.memory_space<vmem>>, %arg3: memref<32x1xf32, #tpu.memory_space<vmem>>, %arg4: memref<32x32xf32, #tpu.memory_space<vmem>>, %arg5: memref<32x1xf32, #tpu.memory_space<vmem>>, %arg6: memref<32x32xf32, #tpu.memory_space<vmem>>, %arg7: memref<32x1xf32, #tpu.memory_space<vmem>>, %arg8: memref<7x32xf32, #tpu.memory_space<vmem>>, %arg9: memref<7x1xf32, #tpu.memory_space<vmem>>, %arg10: memref<7x128xf32, #tpu.memory_space<vmem>>) attributes {dimension_semantics = [#tpu.dimension_semantics<parallel>], iteration_bounds = array<i64: 1>, scalar_prefetch = 0 : i64, scratch_operands = 0 : i64, tpu.core_type = #tpu.core_type<tc>, window_params = [{transform_indices = @transform_0, window_bounds = array<i64: 12, 128>}, {pipeline_mode = #tpu.pipeline_mode<synchronous>, transform_indices = @transform_1, window_bounds = array<i64: 32, 12>}, {pipeline_mode = #tpu.pipeline_mode<synchronous>, transform_indices = @transform_2, window_bounds = array<i64: 32, 1>}, {pipeline_mode = #tpu.pipeline_mode<synchronous>, transform_indices = @transform_3, window_bounds = array<i64: 32, 32>}, {pipeline_mode = #tpu.pipeline_mode<synchronous>, transform_indices = @transform_4, window_bounds = array<i64: 32, 1>}, {pipeline_mode = #tpu.pipeline_mode<synchronous>, transform_indices = @transform_5, window_bounds = array<i64: 32, 32>}, {pipeline_mode = #tpu.pipeline_mode<synchronous>, transform_indices = @transform_6, window_bounds = array<i64: 32, 1>}, {pipeline_mode = #tpu.pipeline_mode<synchronous>, transform_indices = @transform_7, window_bounds = array<i64: 7, 32>}, {pipeline_mode = #tpu.pipeline_mode<synchronous>, transform_indices = @transform_8, window_bounds = array<i64: 7, 1>}, {transform_indices = @transform_9, window_bounds = array<i64: 7, 128>}]} {
    %c0 = arith.constant 0 : index
    %c0_0 = arith.constant 0 : index
    %0 = vector.load %arg1[%c0, %c0_0] : memref<12x128xf32, #tpu.memory_space<vmem>>, vector<12x128xf32>
    %c0_1 = arith.constant 0 : index
    %c0_2 = arith.constant 0 : index
    %1 = vector.load %arg2[%c0_1, %c0_2] : memref<32x12xf32, #tpu.memory_space<vmem>>, vector<32x12xf32>
    %cst = arith.constant dense<0.000000e+00> : vector<32x128xf32>
    %2 = tpu.matmul %1, %0, %cst {dimension_numbers = #tpu.dot_dimension_numbers<[1], [0], [0], [1], [0, 0, 1, 1], [], []>} : vector<32x12xf32>, vector<12x128xf32>, vector<32x128xf32> -> vector<32x128xf32>
    %c0_3 = arith.constant 0 : index
    %c0_4 = arith.constant 0 : index
    %3 = vector.load %arg3[%c0_3, %c0_4] : memref<32x1xf32, #tpu.memory_space<vmem>>, vector<32x1xf32>
    %4 = vector.broadcast %3 : vector<32x1xf32> to vector<32x128xf32>
    %5 = arith.addf %2, %4 : vector<32x128xf32>
    %cst_5 = arith.constant 0.000000e+00 : f32
    %6 = vector.broadcast %cst_5 : f32 to vector<32x128xf32>
    %7 = arith.maximumf %5, %6 : vector<32x128xf32>
    %c0_6 = arith.constant 0 : index
    %c0_7 = arith.constant 0 : index
    %8 = vector.load %arg4[%c0_6, %c0_7] : memref<32x32xf32, #tpu.memory_space<vmem>>, vector<32x32xf32>
    %cst_8 = arith.constant dense<0.000000e+00> : vector<32x128xf32>
    %9 = tpu.matmul %8, %7, %cst_8 {dimension_numbers = #tpu.dot_dimension_numbers<[1], [0], [0], [1], [0, 0, 1, 1], [], []>} : vector<32x32xf32>, vector<32x128xf32>, vector<32x128xf32> -> vector<32x128xf32>
    %c0_9 = arith.constant 0 : index
    %c0_10 = arith.constant 0 : index
    %10 = vector.load %arg5[%c0_9, %c0_10] : memref<32x1xf32, #tpu.memory_space<vmem>>, vector<32x1xf32>
    %11 = vector.broadcast %10 : vector<32x1xf32> to vector<32x128xf32>
    %12 = arith.addf %9, %11 : vector<32x128xf32>
    %cst_11 = arith.constant 0.000000e+00 : f32
    %13 = vector.broadcast %cst_11 : f32 to vector<32x128xf32>
    %14 = arith.maximumf %12, %13 : vector<32x128xf32>
    %c0_12 = arith.constant 0 : index
    %c0_13 = arith.constant 0 : index
    %15 = vector.load %arg6[%c0_12, %c0_13] : memref<32x32xf32, #tpu.memory_space<vmem>>, vector<32x32xf32>
    %cst_14 = arith.constant dense<0.000000e+00> : vector<32x128xf32>
    %16 = tpu.matmul %15, %14, %cst_14 {dimension_numbers = #tpu.dot_dimension_numbers<[1], [0], [0], [1], [0, 0, 1, 1], [], []>} : vector<32x32xf32>, vector<32x128xf32>, vector<32x128xf32> -> vector<32x128xf32>
    %c0_15 = arith.constant 0 : index
    %c0_16 = arith.constant 0 : index
    %17 = vector.load %arg7[%c0_15, %c0_16] : memref<32x1xf32, #tpu.memory_space<vmem>>, vector<32x1xf32>
    %18 = vector.broadcast %17 : vector<32x1xf32> to vector<32x128xf32>
    %19 = arith.addf %16, %18 : vector<32x128xf32>
    %cst_17 = arith.constant 0.000000e+00 : f32
    %20 = vector.broadcast %cst_17 : f32 to vector<32x128xf32>
    %21 = arith.maximumf %19, %20 : vector<32x128xf32>
    %c0_18 = arith.constant 0 : index
    %c0_19 = arith.constant 0 : index
    %22 = vector.load %arg8[%c0_18, %c0_19] : memref<7x32xf32, #tpu.memory_space<vmem>>, vector<7x32xf32>
    %cst_20 = arith.constant dense<0.000000e+00> : vector<7x128xf32>
    %23 = tpu.matmul %22, %21, %cst_20 {dimension_numbers = #tpu.dot_dimension_numbers<[1], [0], [0], [1], [0, 0, 1, 1], [], []>} : vector<7x32xf32>, vector<32x128xf32>, vector<7x128xf32> -> vector<7x128xf32>
    %c0_21 = arith.constant 0 : index
    %c0_22 = arith.constant 0 : index
    %24 = vector.load %arg9[%c0_21, %c0_22] : memref<7x1xf32, #tpu.memory_space<vmem>>, vector<7x1xf32>
    %25 = vector.broadcast %24 : vector<7x1xf32> to vector<7x128xf32>
    %26 = arith.addf %23, %25 : vector<7x128xf32>
    %c0_23 = arith.constant 0 : index
    %c0_24 = arith.constant 0 : index
    %27 = vector.load %arg10[%c0_23, %c0_24] : memref<7x128xf32, #tpu.memory_space<vmem>>, vector<7x128xf32>
    tpu.vector_store %arg10[%c0_23, %c0_24], %26 {strides = array<i32>} : memref<7x128xf32, #tpu.memory_space<vmem>>, vector<7x128xf32>,
    return
  }
  func.func @transform_0(%arg0: i32) -> (i32, i32) {
    %c0_i32 = arith.constant 0 : i32
    %c0_i32_0 = arith.constant 0 : i32
    return %c0_i32, %arg0 : i32, i32
  }
  func.func @transform_1(%arg0: i32) -> (i32, i32) {
    %c0_i32 = arith.constant 0 : i32
    %c0_i32_0 = arith.constant 0 : i32
    %c0_i32_1 = arith.constant 0 : i32
    return %c0_i32, %c0_i32_0 : i32, i32
  }
  func.func @transform_2(%arg0: i32) -> (i32, i32) {
    %c0_i32 = arith.constant 0 : i32
    %c0_i32_0 = arith.constant 0 : i32
    %c0_i32_1 = arith.constant 0 : i32
    return %c0_i32, %c0_i32_0 : i32, i32
  }
  func.func @transform_3(%arg0: i32) -> (i32, i32) {
    %c0_i32 = arith.constant 0 : i32
    %c0_i32_0 = arith.constant 0 : i32
    %c0_i32_1 = arith.constant 0 : i32
    return %c0_i32, %c0_i32_0 : i32, i32
  }
  func.func @transform_4(%arg0: i32) -> (i32, i32) {
    %c0_i32 = arith.constant 0 : i32
    %c0_i32_0 = arith.constant 0 : i32
    %c0_i32_1 = arith.constant 0 : i32
    return %c0_i32, %c0_i32_0 : i32, i32
  }
  func.func @transform_5(%arg0: i32) -> (i32, i32) {
    %c0_i32 = arith.constant 0 : i32
    %c0_i32_0 = arith.constant 0 : i32
    %c0_i32_1 = arith.constant 0 : i32
    return %c0_i32, %c0_i32_0 : i32, i32
  }
  func.func @transform_6(%arg0: i32) -> (i32, i32) {
    %c0_i32 = arith.constant 0 : i32
    %c0_i32_0 = arith.constant 0 : i32
    %c0_i32_1 = arith.constant 0 : i32
    return %c0_i32, %c0_i32_0 : i32, i32
  }
  func.func @transform_7(%arg0: i32) -> (i32, i32) {
    %c0_i32 = arith.constant 0 : i32
    %c0_i32_0 = arith.constant 0 : i32
    %c0_i32_1 = arith.constant 0 : i32
    return %c0_i32, %c0_i32_0 : i32, i32
  }
  func.func @transform_8(%arg0: i32) -> (i32, i32) {
    %c0_i32 = arith.constant 0 : i32
    %c0_i32_0 = arith.constant 0 : i32
    %c0_i32_1 = arith.constant 0 : i32
    return %c0_i32, %c0_i32_0 : i32, i32
  }
  func.func @transform_9(%arg0: i32) -> (i32, i32) {
    %c0_i32 = arith.constant 0 : i32
    %c0_i32_0 = arith.constant 0 : i32
    return %c0_i32, %arg0 : i32, i32
  }
}

</mosaic_0001>

<bundles_post_ra>
// kernel: net_forward.1
= control target key start
LH: loop header
LB: loop body
LE: loop exit
PB: predicated region body
PF: predicated region fallthrough
CT: control target
= control target key end

     0   :  { %vm75_vm0 = vcmask 1043456   ;;  %vm62_vm1 = vcmask 97280   ;;  %vm637_vm2 = vmmov 1   ;;  %v638_v2 = vmov 0   ;;  %s792_s0 = inlined_call_operand.vmem [shape: f32[12,128], index: 0, kind: input, shape index: {}]   ;;  %s793_s1 = inlined_call_operand.vmem [shape: f32[32,12], index: 1, kind: input, shape index: {}]   ;;  %s794_s2 = inlined_call_operand.vmem [shape: f32[32,1], index: 2, kind: input, shape index: {}]   ;;  %s795_s4 = inlined_call_operand.vmem [shape: f32[32,1], index: 4, kind: input, shape index: {}]   ;;  %s796_s6 = inlined_call_operand.vmem [shape: f32[32,1], index: 6, kind: input, shape index: {}]   ;;  %s797_s8 = inlined_call_operand.vmem [shape: f32[7,1], index: 8, kind: input, shape index: {}]   ;;  %s798_s3 = inlined_call_operand.vmem [shape: f32[32,32], index: 3, kind: input, shape index: {}]   ;;  %s799_s5 = inlined_call_operand.vmem [shape: f32[32,32], index: 5, kind: input, shape index: {}]   ;;  %s800_s7 = inlined_call_operand.vmem [shape: f32[7,32], index: 7, kind: input, shape index: {}]   ;;  %s801_s9 = inlined_call_operand.vmem [shape: f32[7,128], index: 9, kind: output, shape index: {}]  }
   0x1   :  { %v32_v0 = vld [vmem:[%s792_s0] sm:$0xff]  ;;  %v33_v1 = vld [vmem:[%s792_s0 + $0x8] sm:$0xf]  ;;  %vm603_vm3 = vmpackc.low %vm75_vm0, %vm637_vm2  ;;  %635 = vset.pattern.permute.xlu0 %v638_v2  ;;  %636 = vset.pattern.permute.xlu1 %v638_v2  ;;  %vm196_vm4 = vcmask 261120   ;;  %vm640_vm5 = vmmov 0   ;;  %v641_v2 = vmov 0.0  }
   0x2   :  { %v602_v3 = vpack.c.bf16 %v33_v1, %v32_v0  ;;  %v34_v4 = vld [vmem:[%s793_s1] sm:$0xff]  ;;  %v40_v6 = vld [vmem:[%s794_s2 + $0x10] sm:$0xff]  ;;  %v35_v7 = vld [vmem:[%s793_s1 + $0x8] sm:$0xff]  ;;  %v639_v1 = vmov 0.0|0.0  }
   0x3   :  { %557 = vmatprep.mubr.msk.f32.mxu0 %vm62_vm1, %v34_v4  ;;  %v38_v5 = vld [vmem:[%s794_s2] sm:$0xff]  ;;  %v39_v8 = vld [vmem:[%s794_s2 + $0x8] sm:$0xff]  ;;  %54 = vperm.xlu1 %636, %v40_v6   ;;  %v36_v9 = vld [vmem:[%s793_s1 + $0x10] sm:$0xff] }
   0x4   :  { %604 = vmatprep.subr.msk.bf16.mxu0 %vm603_vm3, %v602_v3  ;;  %44 = vperm.xlu0 %635, %v38_v5   ;;  %v41_v10 = vld [vmem:[%s794_s2 + $0x18] sm:$0xff]  ;;  %v172_v12 = vld [vmem:[%s795_s4] sm:$0xff]  ;;  %v173_v13 = vld [vmem:[%s795_s4 + $0x8] sm:$0xff] }
   0x5   :  { %607 = vmatpush3.bf16.msk.msra.mxu0 %vm603_vm3, %v602_v3  ;;  %v37_v11 = vld [vmem:[%s793_s1 + $0x18] sm:$0xff]  ;;  %v174_v14 = vld [vmem:[%s795_s4 + $0x10] sm:$0xff]  ;;  %v302_v16 = vld [vmem:[%s796_s6] sm:$0xff] }
   0x6   :  { %v175_v15 = vld [vmem:[%s795_s4 + $0x18] sm:$0xff]  ;;  %v303_v17 = vld [vmem:[%s796_s6 + $0x8] sm:$0xff]  ;;  %v304_v18 = vld [vmem:[%s796_s6 + $0x10] sm:$0xff] }
   0x7   :  { %59 = vperm.xlu1 %636, %v41_v10   ;;  %v305_v19 = vld [vmem:[%s796_s6 + $0x18] sm:$0xff]  ;;  %v428_v20 = vld [vmem:[%s797_s8] sm:$0x7f]  ;;  %v169_v40 = vld [vmem:[%s798_s3 + $0x8] sm:$0xff] }
   0x8   :  { %558 = vmatmul.mubr.msk.f32.vlgmr.msra.gmra.mrb[0].mxu0 %vm62_vm1, %v35_v7  ;;  %49 = vperm.xlu0 %635, %v39_v8   ;;  %v168_v21 = vld [vmem:[%s798_s3] sm:$0xff]  ;;  %v170_v41 = vld [vmem:[%s798_s3 + $0x10] sm:$0xff]  ;;  %v171_v42 = vld [vmem:[%s798_s3 + $0x18] sm:$0xff] }
   0x9   :  { %560 = vmatprep.mubr.msk.f32.mxu0 %vm62_vm1, %v36_v9  ;;  %571 = vmatprep.mubr.msk.f32.mxu1 %vm196_vm4, %v168_v21  ;;  %v298_v43 = vld [vmem:[%s799_s5] sm:$0xff]  ;;  %v299_v62 = vld [vmem:[%s799_s5 + $0x8] sm:$0xff]  ;;  %v300_v63 = vld [vmem:[%s799_s5 + $0x10] sm:$0xff] }
   0xa   :  { %v301_v0 = vld [vmem:[%s799_s5 + $0x18] sm:$0xff]  ;;  %v427_v21 = vld [vmem:[%s800_s7] sm:$0x7f] }
   0xb   :  { %183 = vperm.xlu1 %636, %v173_v13  }
   0xc   :  { %561 = vmatmul.mubr.msk.f32.gmra.mrb[2].mxu0 %vm62_vm1, %v37_v11  ;;  %178 = vperm.xlu0 %635, %v172_v12  }
   0xd   :  { %585 = vmatprep.mubr.msk.f32.mxu0 %vm196_vm4, %v298_v43 }
   0xf   :  { %193 = vperm.xlu1 %636, %v175_v15  }
  0x10   :  { %188 = vperm.xlu0 %635, %v174_v14  }
  0x13   :  { %313 = vperm.xlu1 %636, %v303_v17  }
  0x14   :  { %308 = vperm.xlu0 %635, %v302_v16  }
  0x17   :  { %323 = vperm.xlu1 %636, %v305_v19  }
  0x18   :  { %318 = vperm.xlu0 %635, %v304_v18  }
  0x1c   :  { %431 = vperm.xlu0 %635, %v428_v20  }
  0x82   :  { %v55_v23 = vpop.permute.xlu1 %54 }
  0x83   :  { %v45_v22 = vpop.permute.xlu0 %44 }
  0x86   :  { %v60_v30 = vpop.permute.xlu1 %59 }
  0x87   :  { %v50_v24 = vpop.permute.xlu0 %49 }
  0x8a   :  { %v184_v44 = vpop.permute.xlu1 %183 }
  0x8b   :  { %v179_v45 = vpop.permute.xlu0 %178 }
  0x8e   :  { %v194_v51 = vpop.permute.xlu1 %193 }
  0x8f   :  { %v189_v54 = vpop.permute.xlu0 %188 }
  0x92   :  { %v314_v3 = vpop.permute.xlu1 %313 }
  0x93   :  { %v309_v4 = vpop.permute.xlu0 %308 }
  0x96   :  { %v324_v10 = vpop.permute.xlu1 %323 }
  0x97   :  { %v319_v13 = vpop.permute.xlu0 %318 }
  0xdb   :  { %v559_v25 = vpop.f32.mrb[0].mxu0 }
  0xdc   :  { %v151_v26 = vadd.f32 %v559_v25, %v50_v24  ;;  %v145_v27 = vpop.f32.mrb[1].mxu0 }
  0xdd   :  { %v146_v28 = vadd.f32 %v145_v27, %v45_v22  ;;  %v432_v22 = vpop.permute.xlu0 %431 }
  0xde   :  { %v165_v29 = vmax.f32 %v151_v26, 0.0 }
  0xdf   :  { %v164_v31 = vmax.f32 %v146_v28, 0.0  ;;  %v562_v32 = vpop.f32.mrb[2].mxu0 }
  0xe0   :  { %v161_v33 = vadd.f32 %v562_v32, %v60_v30  ;;  %v155_v34 = vpop.f32.mrb[3].mxu0 }
  0xe1   :  { %v156_v35 = vadd.f32 %v155_v34, %v55_v23  ;;  %v608_v36 = vpack.c.bf16 %v165_v29, %v164_v31 }
  0xe2   :  { %v167_v37 = vmax.f32 %v161_v33, 0.0 }
  0xe3   :  { %v166_v38 = vmax.f32 %v156_v35, 0.0  ;;  %609 = vmatprep.subr.bf16.mxu1 %v608_v36 }
  0xe4   :  { %611 = vmatpush3.bf16.msra.mxu1 %v608_v36 }
  0xe5   :  { %v612_v39 = vpack.c.bf16 %v167_v37, %v166_v38 }
  0xe7   :  { %613 = vmatprep.subr.bf16.mxu1 %v612_v39 }
  0xe8   :  { %615 = vmatpush3.bf16.msra.mxu1 %v612_v39 }
  0xe9   :  { %624 = vmatprep.subr.bf16.mxu1 %v639_v1 }
  0xeb   :  { %572 = vmatmul.mubr.msk.f32.vlgmr.msra.gmra.mrb[0].mxu1 %vm196_vm4, %v169_v40 }
  0xec   :  { %574 = vmatprep.mubr.msk.f32.mxu1 %vm196_vm4, %v170_v41 }
  0xef   :  { %575 = vmatmul.mubr.msk.f32.gmra.mrb[2].mxu1 %vm196_vm4, %v171_v42 }
  0xf0   :  { %599 = vmatprep.mubr.msk.f32.mxu1 %vm640_vm5, %v641_v2 }
 0x1be   :  { %v573_v46 = vpop.f32.mrb[0].mxu1 }
 0x1bf   :  { %v281_v47 = vadd.f32 %v573_v46, %v184_v44  ;;  %v275_v48 = vpop.f32.mrb[1].mxu1 }
 0x1c0   :  { %v276_v49 = vadd.f32 %v275_v48, %v179_v45 }
 0x1c1   :  { %v295_v50 = vmax.f32 %v281_v47, 0.0 }
 0x1c2   :  { %v294_v52 = vmax.f32 %v276_v49, 0.0  ;;  %v576_v53 = vpop.f32.mrb[2].mxu1 }
 0x1c3   :  { %v291_v55 = vadd.f32 %v576_v53, %v194_v51  ;;  %v285_v56 = vpop.f32.mrb[3].mxu1 }
 0x1c4   :  { %v616_v57 = vpack.c.bf16 %v295_v50, %v294_v52  ;;  %v286_v58 = vadd.f32 %v285_v56, %v189_v54 }
 0x1c5   :  { %v297_v59 = vmax.f32 %v291_v55, 0.0 }
 0x1c6   :  { %v296_v60 = vmax.f32 %v286_v58, 0.0  ;;  %617 = vmatprep.subr.bf16.mxu0 %v616_v57 }
 0x1c7   :  { %619 = vmatpush3.bf16.msra.mxu0 %v616_v57 }
 0x1c8   :  { %v620_v61 = vpack.c.bf16 %v297_v59, %v296_v60 }
 0x1ca   :  { %621 = vmatprep.subr.bf16.mxu0 %v620_v61 }
 0x1cb   :  { %623 = vmatpush3.bf16.msra.mxu0 %v620_v61 }
 0x1ce   :  { %586 = vmatmul.mubr.msk.f32.vlgmr.msra.gmra.mrb[4].mxu0 %vm196_vm4, %v299_v62 }
 0x1cf   :  { %588 = vmatprep.mubr.msk.f32.mxu0 %vm196_vm4, %v300_v63 }
 0x1d2   :  { %589 = vmatmul.mubr.msk.f32.gmra.mrb[6].mxu0 %vm196_vm4, %v301_v0 }
 0x2a1   :  { %v587_v5 = vpop.f32.mrb[4].mxu0 }
 0x2a2   :  { %v410_v6 = vadd.f32 %v587_v5, %v314_v3  ;;  %v404_v7 = vpop.f32.mrb[5].mxu0 }
 0x2a3   :  { %v405_v8 = vadd.f32 %v404_v7, %v309_v4 }
 0x2a4   :  { %v424_v9 = vmax.f32 %v410_v6, 0.0 }
 0x2a5   :  { %v423_v11 = vmax.f32 %v405_v8, 0.0  ;;  %v590_v12 = vpop.f32.mrb[6].mxu0 }
 0x2a6   :  { %v420_v14 = vadd.f32 %v590_v12, %v324_v10  ;;  %v414_v15 = vpop.f32.mrb[7].mxu0 }
 0x2a7   :  { %v625_v16 = vpack.c.bf16 %v424_v9, %v423_v11  ;;  %v415_v17 = vadd.f32 %v414_v15, %v319_v13 }
 0x2a8   :  { %v426_v18 = vmax.f32 %v420_v14, 0.0 }
 0x2a9   :  { %v425_v19 = vmax.f32 %v415_v17, 0.0  ;;  %626 = vmatpush3.bf16.msra.mxu1 %v625_v16 }
 0x2aa   :  { %627 = vmatprep.subr.bf16.mxu1 %v639_v1 }
 0x2ab   :  { %v628_v20 = vpack.c.bf16 %v426_v18, %v425_v19 }
 0x2ad   :  { %629 = vmatpush3.bf16.msra.mxu1 %v628_v20 }
 0x2b0   :  { %600 = vmatmul.mubr.msk.f32.vlgmr.msra.gmra.mrb[4].mxu1 %vm196_vm4, %v427_v21 }
 0x383   :  { %v503_v23 = vpop.f32.mrb[4].mxu1 }
 0x384   :  { %v504_v24 = vadd.f32 %v503_v23, %v432_v22  ;;  %v601_v25 = vpop.f32.mrb[5].mxu1 }
 0x386   :  { %507 = vst [vmem:[%s801_s9] sm:$0x7f] %v504_v24 }

</bundles_post_ra>
